<compile_context>
chip_gen: v5e
topology: v5e:2x2
jax: 0.10.0
libtpu: 0.0.40
codegen_flags: <defaults>
</compile_context>

<pallas_src>
import functools
import numpy as np
import jax
import jax.numpy as jnp
from jax.experimental import pallas as pl
from jax.experimental.pallas import tpu as pltpu  # TPU backend (no extra params needed)

EPS = 1e-5


# ----------------------------------------------------------------------------
# Fused kernel: InstanceNorm2d(affine) + ReLU + ConvTranspose2d(k=s, pad=0)
# ----------------------------------------------------------------------------
def upsample_kernel(x_ref, gb_ref, w_ref, out_ref):
    # x_ref  : (B, Cin, H*W)        f32
    # gb_ref : (Cin, 2)             f32   column 0 = gamma, column 1 = beta
    # w_ref  : (Cout*KH*KW, Cin)    f32   row index ordered (co, kh, kw)
    # out_ref: (B, Cout*KH*KW, H*W) bf16 (f32 accumulation, cast on store)
    x = x_ref[...]                                            # (B, Cin, HW)

    # Per-(b, c) statistics; one-pass (biased) variance.
    mean = jnp.mean(x, axis=2, keepdims=True)                 # (B, Cin, 1)
    var = jnp.maximum(jnp.mean(x * x, axis=2, keepdims=True) - mean * mean, 0.0)

    gb = gb_ref[...]                                          # (Cin, 2)
    gamma = gb[:, 0:1][None]                                  # (1, Cin, 1)
    beta = gb[:, 1:2][None]

    # Fold affine norm into per-channel scalars: a = relu(x*s + t)
    s = gamma * jax.lax.rsqrt(var + EPS)                      # (B, Cin, 1)
    t = beta - mean * s
    a = jnp.maximum(x * s + t, 0.0)                           # norm + ReLU, f32

    # ConvTranspose2d with kernel==stride, padding=0 is a pure matmul:
    #   out[b, (co,kh,kw), h*W+w] = sum_ci W[(co,kh,kw), ci] * a[b, ci, h*W+w]
    # Co4 stays the LHS M-dim so the output is lane-dense in HW.
    w = w_ref[...]                                            # (Co4, Cin)
    for b in range(x.shape[0]):                               # static (B small)
        out_ref[b] = jnp.dot(
            w, a[b], preferred_element_type=jnp.float32).astype(out_ref.dtype)


def upsample_forward(x, params, kh, kw, out_dtype=jnp.bfloat16):
    """x: [B, Cin, H, W] -> [B, Cout, H*kh, W*kw] (ConvTranspose2d k=s, pad=0)."""
    B, Cin, H, W = x.shape
    HW = H * W
    # Lane-density (perf, not correctness): keep HW a multiple of 128.
    assert HW % 128 == 0, "H*W must be a multiple of 128 for lane-dense stores"

    w_mat = params['w_mat']                      # (Cout*kh*kw, Cin), f32
    Co4 = w_mat.shape[0]
    Cout = Co4 // (kh * kw)

    x_flat = x.reshape(B, Cin, HW)               # layout-identical, free

    # Single invocation, no grid: all operands are whole-array VMEM blocks.
    y = pl.pallas_call(
        upsample_kernel,
        out_shape=jax.ShapeDtypeStruct((B, Co4, HW), out_dtype),
    )(x_flat, params['gb'], w_mat)

    # Pixel-shuffle the (kh, kw) taps into the spatial axes.  Tiny bf16 glue,
    # kept under the same jit so it fuses rather than standing alone.
    y = y.reshape(B, Cout, kh, kw, H, W)
    out = jnp.transpose(y, (0, 1, 4, 2, 5, 3)).reshape(B, Cout, H * kh, W * kw)
    return out
    # TODO(synk): overlapping transposed conv (stride < kernel_size) and
    # nonzero padding (output cropping) are not expressible as this single
    # matmul; only the kernel_size == stride, padding=0 configuration is
    # supported.


# ----------------------------------------------------------------------------
# Pure-JAX reference (f32 everywhere) for a numerical sanity check
# ----------------------------------------------------------------------------
def reference_forward(x, params, kh, kw):
    gamma, beta, w = params['gamma'], params['beta'], params['w']  # w: [Cin,Cout,kh,kw]
    B, Cin, H, W = x.shape
    Cout = w.shape[1]
    m = jnp.mean(x, axis=(2, 3), keepdims=True)
    v = jnp.mean((x - m) ** 2, axis=(2, 3), keepdims=True)
    a = (x - m) * jax.lax.rsqrt(v + EPS) * gamma[None, :, None, None] \
        + beta[None, :, None, None]
    a = jnp.maximum(a, 0.0)
    # ConvTranspose2d, kernel=stride=(kh,kw), padding=0, bias=False:
    y = jnp.einsum('bchw,cokl->bohkwl', a, w)    # [B, Cout, H, kh, W, kw]
    return y.reshape(B, Cout, H * kh, W * kw)


# ----------------------------------------------------------------------------
# Deterministic parameter init (shapes follow the PyTorch module)
# ----------------------------------------------------------------------------
def init_params(key, Cin, Cout, kh, kw):
    k1, k2, k3 = jax.random.split(key, 3)
    gamma = (1.0 + 0.1 * jax.random.normal(k1, (Cin,))).astype(jnp.float32)
    beta = (0.1 * jax.random.normal(k2, (Cin,))).astype(jnp.float32)
    # PyTorch ConvTranspose2d weight layout: [in_channels, out_channels, kH, kW]
    w = (0.15 * jax.random.normal(k3, (Cin, Cout, kh, kw))).astype(jnp.float32)
    # Kernel-ready layouts, prepared ONCE (no per-forward transposes):
    #   w_mat[(co, kh, kw), ci] = w[ci, co, kh, kw]       (f32: strict parity)
    #   gb = [gamma | beta] as one (Cin, 2) operand        (one DMA, not two)
    w_mat = jnp.transpose(w, (1, 2, 3, 0)).reshape(Cout * kh * kw, Cin)
    gb = jnp.stack([gamma, beta], axis=1).astype(jnp.float32)
    return {'gamma': gamma, 'beta': beta, 'w': w, 'w_mat': w_mat, 'gb': gb}


if __name__ == "__main__":
    key = jax.random.PRNGKey(0)
    kx, kp = jax.random.split(key)

    # UpSample(input_channel=32, out_channel=16, scale=(2,2), stride=(2,2),
    #          padding=0, activation=nn.ReLU(),
    #          normalization=lambda c: nn.InstanceNorm2d(c, affine=True))
    B, Cin, H, W = 2, 32, 16, 16
    Cout, KH, KW = 16, 2, 2

    x = jax.random.normal(kx, (B, Cin, H, W), jnp.float32)
    params = init_params(kp, Cin, Cout, KH, KW)

    forward = jax.jit(functools.partial(upsample_forward, kh=KH, kw=KW))
    out = jax.block_until_ready(forward(x, params))
    assert out.shape == (B, Cout, H * KH, W * KW)

    ref = reference_forward(x, params, KH, KW)
    np.testing.assert_allclose(np.asarray(out.astype(jnp.float32)),
                               np.asarray(ref), rtol=2e-2, atol=2e-2)
    print("KERNEL_OK")
</pallas_src>

<mosaic_0001>
module attributes {stable_mosaic.version = 11 : i64} {
  func.func @upsample_kernel(%arg0: memref<2x32x256xf32, #tpu.memory_space<vmem>>, %arg1: memref<32x2xf32, #tpu.memory_space<vmem>>, %arg2: memref<64x32xf32, #tpu.memory_space<vmem>>, %arg3: memref<2x64x256xbf16, #tpu.memory_space<vmem>>) attributes {dimension_semantics = [], scalar_prefetch = 0 : i64, scratch_operands = 0 : i64, tpu.core_type = #tpu.core_type<tc>} {
    %c0 = arith.constant 0 : index
    %c0_0 = arith.constant 0 : index
    %c0_1 = arith.constant 0 : index
    %0 = vector.load %arg0[%c0, %c0_0, %c0_1] : memref<2x32x256xf32, #tpu.memory_space<vmem>>, vector<2x32x256xf32>
    %cst = arith.constant dense<0.000000e+00> : vector<2x32xf32>
    %1 = vector.multi_reduction <add>, %0, %cst [2] : vector<2x32x256xf32> to vector<2x32xf32>
    %2 = vector.shape_cast %1 : vector<2x32xf32> to vector<2x32x1xf32>
    %cst_2 = arith.constant 2.560000e+02 : f32
    %3 = vector.broadcast %cst_2 : f32 to vector<2x32x1xf32>
    %4 = arith.divf %2, %3 : vector<2x32x1xf32>
    %5 = arith.mulf %0, %0 : vector<2x32x256xf32>
    %cst_3 = arith.constant dense<0.000000e+00> : vector<2x32xf32>
    %6 = vector.multi_reduction <add>, %5, %cst_3 [2] : vector<2x32x256xf32> to vector<2x32xf32>
    %7 = vector.shape_cast %6 : vector<2x32xf32> to vector<2x32x1xf32>
    %cst_4 = arith.constant 2.560000e+02 : f32
    %8 = vector.broadcast %cst_4 : f32 to vector<2x32x1xf32>
    %9 = arith.divf %7, %8 : vector<2x32x1xf32>
    %10 = arith.mulf %4, %4 : vector<2x32x1xf32>
    %11 = arith.subf %9, %10 : vector<2x32x1xf32>
    %cst_5 = arith.constant 0.000000e+00 : f32
    %12 = vector.broadcast %cst_5 : f32 to vector<2x32x1xf32>
    %13 = arith.maximumf %11, %12 : vector<2x32x1xf32>
    %c0_6 = arith.constant 0 : index
    %c0_7 = arith.constant 0 : index
    %14 = vector.load %arg1[%c0_6, %c0_7] : memref<32x2xf32, #tpu.memory_space<vmem>>, vector<32x2xf32>
    %15 = vector.extract_strided_slice %14 {offsets = [0, 0], sizes = [32, 1], strides = [1, 1]} : vector<32x2xf32> to vector<32x1xf32>
    %16 = vector.shape_cast %15 : vector<32x1xf32> to vector<1x32x1xf32>
    %17 = vector.extract_strided_slice %14 {offsets = [0, 1], sizes = [32, 1], strides = [1, 1]} : vector<32x2xf32> to vector<32x1xf32>
    %18 = vector.shape_cast %17 : vector<32x1xf32> to vector<1x32x1xf32>
    %cst_8 = arith.constant 9.99999974E-6 : f32
    %19 = vector.broadcast %cst_8 : f32 to vector<2x32x1xf32>
    %20 = arith.addf %13, %19 : vector<2x32x1xf32>
    %21 = math.rsqrt %20 : vector<2x32x1xf32>
    %22 = vector.broadcast %16 : vector<1x32x1xf32> to vector<2x32x1xf32>
    %23 = arith.mulf %22, %21 : vector<2x32x1xf32>
    %24 = arith.mulf %4, %23 : vector<2x32x1xf32>
    %25 = vector.broadcast %18 : vector<1x32x1xf32> to vector<2x32x1xf32>
    %26 = arith.subf %25, %24 : vector<2x32x1xf32>
    %27 = vector.broadcast %23 : vector<2x32x1xf32> to vector<2x32x256xf32>
    %28 = arith.mulf %0, %27 : vector<2x32x256xf32>
    %29 = vector.broadcast %26 : vector<2x32x1xf32> to vector<2x32x256xf32>
    %30 = arith.addf %28, %29 : vector<2x32x256xf32>
    %cst_9 = arith.constant 0.000000e+00 : f32
    %31 = vector.broadcast %cst_9 : f32 to vector<2x32x256xf32>
    %32 = arith.maximumf %30, %31 : vector<2x32x256xf32>
    %c0_10 = arith.constant 0 : index
    %c0_11 = arith.constant 0 : index
    %33 = vector.load %arg2[%c0_10, %c0_11] : memref<64x32xf32, #tpu.memory_space<vmem>>, vector<64x32xf32>
    %34 = vector.extract_strided_slice %32 {offsets = [0, 0, 0], sizes = [1, 32, 256], strides = [1, 1, 1]} : vector<2x32x256xf32> to vector<1x32x256xf32>
    %35 = vector.shape_cast %34 : vector<1x32x256xf32> to vector<32x256xf32>
    %cst_12 = arith.constant dense<0.000000e+00> : vector<64x256xf32>
    %36 = tpu.matmul %33, %35, %cst_12 {dimension_numbers = #tpu.dot_dimension_numbers<[1], [0], [0], [1], [0, 0, 1, 1], [], []>} : vector<64x32xf32>, vector<32x256xf32>, vector<64x256xf32> -> vector<64x256xf32>
    %37 = arith.truncf %36 : vector<64x256xf32> to vector<64x256xbf16>
    %c0_13 = arith.constant 0 : index
    %c0_14 = arith.constant 0 : index
    %c0_15 = arith.constant 0 : index
    %38 = vector.load %arg3[%c0_13, %c0_14, %c0_15] : memref<2x64x256xbf16, #tpu.memory_space<vmem>>, vector<1x64x256xbf16>
    %39 = vector.shape_cast %38 : vector<1x64x256xbf16> to vector<64x256xbf16>
    %40 = vector.shape_cast %37 : vector<64x256xbf16> to vector<1x64x256xbf16>
    tpu.vector_store %arg3[%c0_13, %c0_14, %c0_15], %40 {strides = array<i32>} : memref<2x64x256xbf16, #tpu.memory_space<vmem>>, vector<1x64x256xbf16>,
    %41 = vector.extract_strided_slice %32 {offsets = [1, 0, 0], sizes = [1, 32, 256], strides = [1, 1, 1]} : vector<2x32x256xf32> to vector<1x32x256xf32>
    %42 = vector.shape_cast %41 : vector<1x32x256xf32> to vector<32x256xf32>
    %cst_16 = arith.constant dense<0.000000e+00> : vector<64x256xf32>
    %43 = tpu.matmul %33, %42, %cst_16 {dimension_numbers = #tpu.dot_dimension_numbers<[1], [0], [0], [1], [0, 0, 1, 1], [], []>} : vector<64x32xf32>, vector<32x256xf32>, vector<64x256xf32> -> vector<64x256xf32>
    %44 = arith.truncf %43 : vector<64x256xf32> to vector<64x256xbf16>
    %c1 = arith.constant 1 : index
    %c0_17 = arith.constant 0 : index
    %c0_18 = arith.constant 0 : index
    %45 = vector.load %arg3[%c1, %c0_17, %c0_18] : memref<2x64x256xbf16, #tpu.memory_space<vmem>>, vector<1x64x256xbf16>
    %46 = vector.shape_cast %45 : vector<1x64x256xbf16> to vector<64x256xbf16>
    %47 = vector.shape_cast %44 : vector<64x256xbf16> to vector<1x64x256xbf16>
    tpu.vector_store %arg3[%c1, %c0_17, %c0_18], %47 {strides = array<i32>} : memref<2x64x256xbf16, #tpu.memory_space<vmem>>, vector<1x64x256xbf16>,
    return
  }
}

</mosaic_0001>

<bundles_post_ra>
// kernel: upsample_forward.1
= control target key start
LH: loop header
LB: loop body
LE: loop exit
PB: predicated region body
PF: predicated region fallthrough
CT: control target
= control target key end

     0   :  { %v719_v48 = vmov 256.0   ;;  %s720_s18 = smov 1   ;;  %s1128_s0 = inlined_call_operand.vmem [shape: f32[2,32,256], index: 0, kind: input, shape index: {}]   ;;  %s1129_s1 = inlined_call_operand.vmem [shape: f32[32,2], index: 1, kind: input, shape index: {}]   ;;  %s1130_s2 = inlined_call_operand.vmem [shape: f32[64,32], index: 2, kind: input, shape index: {}]   ;;  %s1131_s3 = inlined_call_operand.vmem [shape: bf16[2,64,256], index: 3, kind: output, shape index: {}]  }
   0x1   :  { %v746_v0 = vld [vmem:[%s1128_s0 + $0x70] sm:$0xff]  ;;  %v751_v1 = vld [vmem:[%s1128_s0 + $0x78] sm:$0xff]  ;;  %v756_v2 = vld [vmem:[%s1128_s0 + $0x60] sm:$0xff]  ;;  %701 = vrcp.f32 %v719_v48 }
   0x2   :  { %v51_v3 = vadd.f32 %v751_v1, %v746_v0  ;;  %v83_v4 = vmul.f32 %v746_v0, %v746_v0  ;;  %v84_v5 = vmul.f32 %v751_v1, %v751_v1  ;;  %v767_v6 = vld [vmem:[%s1128_s0 + $0x68] sm:$0xff]  ;;  %v81_v7 = vmul.f32 %v756_v2, %v756_v2  ;;  %v776_v11 = vld [vmem:[%s1128_s0 + $0x50] sm:$0xff]  ;;  %v781_v12 = vld [vmem:[%s1128_s0 + $0x58] sm:$0xff] }
   0x3   :  { %v82_v8 = vmul.f32 %v767_v6, %v767_v6  ;;  %v48_v13 = vadd.f32 %v767_v6, %v756_v2  ;;  %v788_v14 = vld [vmem:[%s1128_s0 + $0x30] sm:$0xff]  ;;  %v793_v15 = vld [vmem:[%s1128_s0 + $0x38] sm:$0xff]  ;;  %v45_v16 = vadd.f32 %v781_v12, %v776_v11  ;;  %v802_v18 = vld [vmem:[%s1128_s0 + $0x40] sm:$0xff]  ;;  %v79_v20 = vmul.f32 %v776_v11, %v776_v11 }
   0x4   :  { %52 = vadd.xlane.f32.xlu0 %v51_v3  ;;  %v106_v9 = vadd.f32 %v84_v5, %v83_v4  ;;  %v39_v17 = vadd.f32 %v793_v15, %v788_v14  ;;  %v807_v19 = vld [vmem:[%s1128_s0 + $0x48] sm:$0xff]  ;;  %v80_v21 = vmul.f32 %v781_v12, %v781_v12  ;;  %v818_v23 = vld [vmem:[%s1128_s0 + $0x20] sm:$0xff]  ;;  %v75_v27 = vmul.f32 %v788_v14, %v788_v14  ;;  %v838_v32 = vld [vmem:[%s1128_s0 + $0x10] sm:$0xff] }
   0x5   :  { %v103_v10 = vadd.f32 %v82_v8, %v81_v7  ;;  %v42_v22 = vadd.f32 %v807_v19, %v802_v18  ;;  %v823_v24 = vld [vmem:[%s1128_s0 + $0x28] sm:$0xff]  ;;  %v76_v28 = vmul.f32 %v793_v15, %v793_v15  ;;  %v77_v29 = vmul.f32 %v802_v18, %v802_v18  ;;  %v843_v33 = vld [vmem:[%s1128_s0 + $0x18] sm:$0xff]  ;;  %v858_v40 = vld [vmem:[%s1128_s0] sm:$0xff] }
   0x6   :  { %107 = vadd.xlane.f32.xlu1 %v106_v9  ;;  %v100_v25 = vadd.f32 %v80_v21, %v79_v20  ;;  %v36_v26 = vadd.f32 %v823_v24, %v818_v23  ;;  %v78_v30 = vmul.f32 %v807_v19, %v807_v19  ;;  %v33_v35 = vadd.f32 %v843_v33, %v838_v32  ;;  %v863_v41 = vld [vmem:[%s1128_s0 + $0x8] sm:$0xff]  ;;  %v907_v48 = vld [vmem:[%s1129_s1 + $0x18] sm:$0xff] }
   0x7   :  { %104 = vadd.xlane.f32.xlu2 %v103_v10  ;;  %v94_v31 = vadd.f32 %v76_v28, %v75_v27  ;;  %v73_v36 = vmul.f32 %v818_v23, %v818_v23  ;;  %v74_v37 = vmul.f32 %v823_v24, %v823_v24  ;;  %v71_v38 = vmul.f32 %v838_v32, %v838_v32  ;;  %v702_v49 = vpop.eup %701 }
   0x8   :  { %v97_v34 = vadd.f32 %v78_v30, %v77_v29  ;;  %v72_v39 = vmul.f32 %v843_v33, %v843_v33  ;;  %v30_v43 = vadd.f32 %v863_v41, %v858_v40  ;;  %v69_v45 = vmul.f32 %v858_v40, %v858_v40 }
   0x9   :  { %v91_v42 = vadd.f32 %v74_v37, %v73_v36  ;;  %v70_v46 = vmul.f32 %v863_v41, %v863_v41  ;;  %v55_v50 = vmul.f32 256.0, %v702_v49  ;;  %vm59_vm0 = vweird.f32 %v702_v49 }
   0xa   :  { %v88_v44 = vadd.f32 %v72_v39, %v71_v38 }
   0xb   :  { %v85_v47 = vadd.f32 %v70_v46, %v69_v45  ;;  %v56_v51 = vsub.f32 1.0, %v55_v50 }
   0xc   :  { %49 = vadd.xlane.f32.xlu0 %v48_v13 }
   0xd   :  { %v57_v52 = vmul.f32 %v702_v49, %v56_v51 }
   0xe   :  { %46 = vadd.xlane.f32.xlu1 %v45_v16 }
   0xf   :  { %40 = vadd.xlane.f32.xlu2 %v39_v17  ;;  %v58_v53 = vadd.f32 %v702_v49, %v57_v52 }
  0x11   :  { %v871_v54 = vsel %vm59_vm0, %v702_v49, %v58_v53 }
  0x14   :  { %43 = vadd.xlane.f32.xlu0 %v42_v22 }
  0x16   :  { %101 = vadd.xlane.f32.xlu1 %v100_v25 }
  0x17   :  { %37 = vadd.xlane.f32.xlu2 %v36_v26 }
  0x1c   :  { %95 = vadd.xlane.f32.xlu0 %v94_v31 }
  0x1e   :  { %98 = vadd.xlane.f32.xlu1 %v97_v34 }
  0x1f   :  { %34 = vadd.xlane.f32.xlu2 %v33_v35 }
  0x24   :  { %92 = vadd.xlane.f32.xlu0 %v91_v42 }
  0x26   :  { %31 = vadd.xlane.f32.xlu1 %v30_v43 }
  0x27   :  { %89 = vadd.xlane.f32.xlu2 %v88_v44 }
  0x2c   :  { %86 = vadd.xlane.f32.xlu0 %v85_v47 }
  0x77   :  { %v53_v55 = vpop.xlane.xlu0 %52 }
  0x78   :  { %v874_v56 = vmul.f32 %v871_v54, %v53_v55 }
  0x79   :  { %v108_v57 = vpop.xlane.xlu1 %107 }
  0x7a   :  { %v124_v58 = vmul.f32 %v874_v56, %v874_v56  ;;  %v116_v59 = vmul.f32 %v108_v57, %v871_v54  ;;  %v105_v60 = vpop.xlane.xlu2 %104 }
  0x7b   :  { %v115_v4 = vmul.f32 %v105_v60, %v871_v54 }
  0x7c   :  { %v132_v61 = vsub.f32 %v116_v59, %v124_v58 }
  0x7e   :  { %v140_v62 = vmax.f32 %v132_v61, 0.0 }
  0x7f   :  { %v50_v63 = vpop.xlane.xlu0 %49 }
  0x80   :  { %v152_v3 = vadd.f32 1e-05, %v140_v62  ;;  %v881_v5 = vmul.f32 %v871_v54, %v50_v63 }
  0x81   :  { %v47_v7 = vpop.xlane.xlu1 %46 }
  0x82   :  { %703 = vrsqrt.f32 %v152_v3  ;;  %v123_v8 = vmul.f32 %v881_v5, %v881_v5  ;;  %v41_v9 = vpop.xlane.xlu2 %40  ;;  %v886_v16 = vmul.f32 %v871_v54, %v47_v7  ;;  %vm229_vm2 = vweird.f32 %v152_v3 }
  0x83   :  { %v891_v27 = vmul.f32 %v871_v54, %v41_v9 }
  0x84   :  { %v131_v10 = vsub.f32 %v115_v4, %v123_v8  ;;  %v122_v26 = vmul.f32 %v886_v16, %v886_v16 }
  0x85   :  { %v120_v36 = vmul.f32 %v891_v27, %v891_v27 }
  0x86   :  { %v139_v13 = vmax.f32 %v131_v10, 0.0 }
  0x87   :  { %v44_v17 = vpop.xlane.xlu0 %43 }
  0x88   :  { %v704_v20 = vpop.eup %703  ;;  %v151_v21 = vadd.f32 1e-05, %v139_v13  ;;  %v895_v31 = vmul.f32 %v871_v54, %v44_v17 }
  0x89   :  { %v224_v22 = vmul.f32 %v704_v20, %v152_v3  ;;  %v102_v25 = vpop.xlane.xlu1 %101  ;;  %vm230_vm1 = vweird.f32 %v704_v20 }
  0x8a   :  { %705 = vrsqrt.f32 %v151_v21  ;;  %v114_v28 = vmul.f32 %v102_v25, %v871_v54  ;;  %v38_v29 = vpop.xlane.xlu2 %37  ;;  %v121_v43 = vmul.f32 %v895_v31, %v895_v31  ;;  %vm231_vm3 = vmor %vm229_vm2, %vm230_vm1  ;;  %vm219_vm4 = vweird.f32 %v151_v21 }
  0x8b   :  { %v225_v30 = vmul.f32 %v704_v20, %v224_v22  ;;  %v911_v50 = vmul.f32 %v871_v54, %v38_v29 }
  0x8c   :  { %v130_v34 = vsub.f32 %v114_v28, %v122_v26 }
  0x8d   :  { %v226_v35 = vmul.f32 0.5, %v225_v30  ;;  %v119_v63 = vmul.f32 %v911_v50, %v911_v50  ;;  %v721_v30 = vmov 0  }
  0x8e   :  { %v138_v37 = vmax.f32 %v130_v34, 0.0  ;;  %695 = vset.pattern.permute.xlu0 %v721_v30  ;;  %696 = vset.pattern.permute.xlu2 %v721_v30 }
  0x8f   :  { %v227_v38 = vsub.f32 1.5, %v226_v35  ;;  %v96_v39 = vpop.xlane.xlu0 %95 }
  0x90   :  { %v706_v42 = vpop.eup %705  ;;  %v901_v44 = vadd.f32 1e-05, %v138_v37  ;;  %v112_v45 = vmul.f32 %v96_v39, %v871_v54 }
  0x91   :  { %v214_v46 = vmul.f32 %v706_v42, %v151_v21  ;;  %v99_v47 = vpop.xlane.xlu1 %98  ;;  %v228_v49 = vmul.f32 %v704_v20, %v227_v38  ;;  %vm220_vm5 = vweird.f32 %v706_v42 }
  0x92   :  { %707 = vrsqrt.f32 %v901_v44  ;;  %v128_v51 = vsub.f32 %v112_v45, %v120_v36  ;;  %v113_v52 = vmul.f32 %v99_v47, %v871_v54  ;;  %v35_v53 = vpop.xlane.xlu2 %34  ;;  %vm221_vm6 = vmor %vm219_vm4, %vm220_vm5  ;;  %vm209_vm8 = vweird.f32 %v901_v44 }
  0x93   :  { %v215_v55 = vmul.f32 %v706_v42, %v214_v46  ;;  %v232_v57 = vsel %vm231_vm3, %v704_v20, %v228_v49  ;;  %v918_v62 = vmul.f32 %v871_v54, %v35_v53  ;;  %v934_v20 = vld [vmem:[%s1129_s1 + $0x10] sm:$0xff] }
  0x94   :  { %v136_v58 = vmax.f32 %v128_v51, 0.0  ;;  %v129_v59 = vsub.f32 %v113_v52, %v121_v43  ;;  %v915_v60 = vmul.f32 %v232_v57, %v907_v48 }
  0x95   :  { %v216_v61 = vmul.f32 0.5, %v215_v55  ;;  %v118_v22 = vmul.f32 %v918_v62, %v918_v62 }
  0x96   :  { %v922_v3 = vadd.f32 1e-05, %v136_v58  ;;  %v137_v4 = vmax.f32 %v129_v59, 0.0  ;;  %v248_v7 = vmul.f32 %v915_v60, %v874_v56 }
  0x97   :  { %v217_v8 = vsub.f32 1.5, %v216_v61  ;;  %v93_v9 = vpop.xlane.xlu0 %92 }
  0x98   :  { %v708_v10 = vpop.eup %707  ;;  %709 = vrsqrt.f32 %v922_v3  ;;  %v927_v13 = vadd.f32 1e-05, %v137_v4  ;;  %v111_v17 = vmul.f32 %v93_v9, %v871_v54  ;;  %271 = vrot.lane.b32.xlu1 %v248_v7, %s720_s18  ;;  %vm189_vm10 = vweird.f32 %v922_v3 }
  0x99   :  { %v218_v56 = vmul.f32 %v706_v42, %v217_v8  ;;  %v204_v21 = vmul.f32 %v708_v10, %v901_v44  ;;  %v32_v25 = vpop.xlane.xlu1 %31  ;;  %vm210_vm7 = vweird.f32 %v708_v10 }
  0x9a   :  { %711 = vrsqrt.f32 %v927_v13  ;;  %v127_v26 = vsub.f32 %v111_v17, %v119_v63  ;;  %v90_v28 = vpop.xlane.xlu2 %89  ;;  %v941_v29 = vmul.f32 %v871_v54, %v32_v25  ;;  %v964_v63 = vld [vmem:[%s1129_s1 + $0x8] sm:$0xff]  ;;  %vm211_vm9 = vmor %vm209_vm8, %vm210_vm7  ;;  %vm199_vm14 = vweird.f32 %v927_v13 }
  0x9b   :  { %v222_v34 = vsel %vm221_vm6, %v706_v42, %v218_v56  ;;  %v205_v35 = vmul.f32 %v708_v10, %v204_v21  ;;  %v110_v36 = vmul.f32 %v90_v28, %v871_v54 }
  0x9c   :  { %v947_v37 = vmul.f32 %v222_v34, %v934_v20  ;;  %v135_v38 = vmax.f32 %v127_v26, 0.0  ;;  %v117_v49 = vmul.f32 %v941_v29, %v941_v29 }
  0x9d   :  { %v206_v39 = vmul.f32 0.5, %v205_v35  ;;  %v126_v43 = vsub.f32 %v110_v36, %v118_v22 }
  0x9e   :  { %v710_v45 = vpop.eup %709  ;;  %v247_v46 = vmul.f32 %v947_v37, %v881_v5  ;;  %v951_v47 = vadd.f32 1e-05, %v135_v38 }
  0x9f   :  { %v207_v51 = vsub.f32 1.5, %v206_v39  ;;  %v184_v42 = vmul.f32 %v710_v45, %v922_v3  ;;  %v134_v52 = vmax.f32 %v126_v43, 0.0  ;;  %v87_v53 = vpop.xlane.xlu0 %86  ;;  %vm190_vm11 = vweird.f32 %v710_v45  ;;  %v978_v3 = vld [vmem:[%s1129_s1] sm:$0xff] }
  0xa0   :  { %v712_v55 = vpop.eup %711  ;;  %713 = vrsqrt.f32 %v951_v47  ;;  %v109_v57 = vmul.f32 %v87_v53, %v871_v54  ;;  %269 = vrot.lane.b32.xlu2 %v247_v46, %s720_s18  ;;  %vm191_vm13 = vmor %vm189_vm10, %vm190_vm11  ;;  %vm179_vm0 = vweird.f32 %v951_v47 }
  0xa1   :  { %v185_v58 = vmul.f32 %v710_v45, %v184_v42  ;;  %v194_v5 = vmul.f32 %v712_v55, %v927_v13  ;;  %v146_v59 = vadd.f32 1e-05, %v134_v52  ;;  %v208_v4 = vmul.f32 %v708_v10, %v207_v51 }
  0xa2   :  { %v125_v61 = vsub.f32 %v109_v57, %v117_v49  ;;  %vm200_vm12 = vweird.f32 %v712_v55 }
  0xa3   :  { %v186_v7 = vmul.f32 0.5, %v185_v58  ;;  %v195_v8 = vmul.f32 %v712_v55, %v194_v5  ;;  %715 = vrsqrt.f32 %v146_v59  ;;  %v212_v9 = vsel %vm211_vm9, %v708_v10, %v208_v4  ;;  %vm201_vm15 = vmor %vm199_vm14, %vm200_vm12 }
  0xa4   :  { %v133_v54 = vmax.f32 %v125_v61, 0.0  ;;  %v967_v21 = vmul.f32 %v212_v9, %v964_v63  ;;  %vm169_vm2 = vweird.f32 %v146_v59  ;;  %vm425_vm9 = vcmask 261120  }
  0xa5   :  { %v187_v17 = vsub.f32 1.5, %v186_v7  ;;  %v196_v56 = vmul.f32 0.5, %v195_v8 }
  0xa6   :  { %v714_v22 = vpop.eup %713  ;;  %v145_v44 = vadd.f32 1e-05, %v133_v54  ;;  %v246_v28 = vmul.f32 %v967_v21, %v886_v16 }
  0xa7   :  { %v197_v25 = vsub.f32 1.5, %v196_v56  ;;  %v174_v26 = vmul.f32 %v714_v22, %v951_v47  ;;  %v188_v34 = vmul.f32 %v710_v45, %v187_v17  ;;  %vm180_vm1 = vweird.f32 %v714_v22 }
  0xa8   :  { %717 = vrsqrt.f32 %v145_v44  ;;  %267 = vrot.lane.b32.xlu0 %v246_v28, %s720_s18  ;;  %vm181_vm4 = vmor %vm179_vm0, %vm180_vm1  ;;  %vm159_vm6 = vweird.f32 %v145_v44 }
  0xa9   :  { %v716_v10 = vpop.eup %715  ;;  %v175_v35 = vmul.f32 %v714_v22, %v174_v26  ;;  %v198_v36 = vmul.f32 %v712_v55, %v197_v25  ;;  %v192_v39 = vsel %vm191_vm13, %v710_v45, %v188_v34 }
  0xaa   :  { %v164_v38 = vmul.f32 %v716_v10, %v146_v59  ;;  %v236_v16 = vmul.f32 %v192_v39, %v907_v48  ;;  %vm170_vm3 = vweird.f32 %v716_v10 }
  0xab   :  { %v176_v43 = vmul.f32 0.5, %v175_v35  ;;  %v202_v46 = vsel %vm201_vm15, %v712_v55, %v198_v36  ;;  %vm171_vm5 = vmor %vm169_vm2, %vm170_vm3 }
  0xac   :  { %v165_v49 = vmul.f32 %v716_v10, %v164_v38  ;;  %v237_v51 = vmul.f32 %v202_v46, %v978_v3  ;;  %v244_v42 = vmul.f32 %v236_v16, %v891_v27 }
  0xad   :  { %v177_v13 = vsub.f32 1.5, %v176_v43 }
  0xae   :  { %v718_v52 = vpop.eup %717  ;;  %v166_v53 = vmul.f32 0.5, %v165_v49  ;;  %v245_v57 = vmul.f32 %v237_v51, %v895_v31  ;;  %263 = vrot.lane.b32.xlu2 %v244_v42, %s720_s18 }
  0xaf   :  { %v154_v45 = vmul.f32 %v718_v52, %v145_v44  ;;  %v178_v58 = vmul.f32 %v714_v22, %v177_v13  ;;  %vm160_vm7 = vweird.f32 %v718_v52 }
  0xb0   :  { %v167_v55 = vsub.f32 1.5, %v166_v53  ;;  %265 = vrot.lane.b32.xlu1 %v245_v57, %s720_s18  ;;  %vm161_vm8 = vmor %vm159_vm6, %vm160_vm7 }
  0xb1   :  { %v155_v5 = vmul.f32 %v718_v52, %v154_v45  ;;  %v182_v47 = vsel %vm181_vm4, %v714_v22, %v178_v58 }
  0xb2   :  { %v235_v61 = vmul.f32 %v182_v47, %v934_v20  ;;  %v168_v27 = vmul.f32 %v716_v10, %v167_v55 }
  0xb3   :  { %v156_v4 = vmul.f32 0.5, %v155_v5 }
  0xb4   :  { %v243_v59 = vmul.f32 %v235_v61, %v911_v50  ;;  %v172_v31 = vsel %vm171_vm5, %v716_v10, %v168_v27  ;;  %v722_v50 = vmov 1  }
  0xb5   :  { %v157_v7 = vsub.f32 1.5, %v156_v4  ;;  %v234_v8 = vmul.f32 %v172_v31, %v964_v63  ;;  %697 = vset.pattern.permute.xlu1 %v722_v50 }
  0xb6   :  { %261 = vrot.lane.b32.xlu0 %v243_v59, %s720_s18 }
  0xb7   :  { %v242_v54 = vmul.f32 %v234_v8, %v918_v62  ;;  %v158_v9 = vmul.f32 %v718_v52, %v157_v7 }
  0xb9   :  { %259 = vrot.lane.b32.xlu2 %v242_v54, %s720_s18  ;;  %v162_v17 = vsel %vm161_vm8, %v718_v52, %v158_v9 }
  0xba   :  { %v233_v56 = vmul.f32 %v162_v17, %v978_v3 }
  0xbc   :  { %v241_v22 = vmul.f32 %v233_v56, %v941_v29 }
  0xbe   :  { %326 = vperm.xlu0 %695, %v915_v60   ;;  %257 = vrot.lane.b32.xlu1 %v241_v22, %s720_s18 }
  0xc1   :  { %321 = vperm.xlu2 %696, %v947_v37  }
  0xc6   :  { %306 = vperm.xlu0 %695, %v236_v16  }
  0xc9   :  { %316 = vperm.xlu2 %696, %v967_v21  }
  0xce   :  { %301 = vperm.xlu0 %695, %v235_v61  }
  0xd1   :  { %311 = vperm.xlu2 %696, %v237_v51  }
  0xd6   :  { %296 = vperm.xlu0 %695, %v234_v8  }
  0xd9   :  { %698 = vset.pattern.permute.xlu2 %v722_v50 }
  0xde   :  { %700 = vset.pattern.permute.xlu0 %v722_v50 }
  0xfa   :  { %v270_v62 = vpop.permute.xlu2 %269 }
  0xfb   :  { %v287_v37 = vsub.f32 %v934_v20, %v270_v62 }
 0x108   :  { %v264_v44 = vpop.permute.xlu2 %263 }
 0x109   :  { %v284_v29 = vsub.f32 %v907_v48, %v264_v44 }
 0x10a   :  { %v272_v25 = vpop.permute.xlu1 %271 }
 0x10b   :  { %v288_v60 = vsub.f32 %v907_v48, %v272_v25  ;;  %362 = vperm.xlu2 %698, %v284_v29  }
 0x10d   :  { %382 = vperm.xlu1 %697, %v288_v60  }
 0x113   :  { %v260_v26 = vpop.permute.xlu2 %259 }
 0x114   :  { %v282_v21 = vsub.f32 %v964_v63, %v260_v26 }
 0x115   :  { %377 = vperm.xlu1 %697, %v287_v37  }
 0x116   :  { %352 = vperm.xlu0 %700, %v282_v21  }
 0x11a   :  { %v268_v28 = vpop.permute.xlu0 %267 }
 0x11b   :  { %v286_v34 = vsub.f32 %v964_v63, %v268_v28  ;;  %v322_v43 = vpop.permute.xlu2 %321 }
 0x11c   :  { %v341_v59 = vmul.f32 %v322_v43, %v756_v2  ;;  %v342_v31 = vmul.f32 %v322_v43, %v767_v6 }
 0x11d   :  { %372 = vperm.xlu1 %697, %v286_v34  }
 0x122   :  { %v266_v10 = vpop.permute.xlu1 %265 }
 0x123   :  { %v285_v35 = vsub.f32 %v978_v3, %v266_v10  ;;  %v317_v16 = vpop.permute.xlu2 %316 }
 0x125   :  { %367 = vperm.xlu1 %697, %v285_v35  }
 0x128   :  { %v262_v36 = vpop.permute.xlu0 %261 }
 0x129   :  { %v283_v48 = vsub.f32 %v934_v20, %v262_v36 }
 0x12b   :  { %357 = vperm.xlu2 %698, %v283_v48   ;;  %v312_v63 = vpop.permute.xlu2 %311 }
 0x12c   :  { %v337_v21 = vmul.f32 %v312_v63, %v802_v18  ;;  %v338_v28 = vmul.f32 %v312_v63, %v807_v19 }
 0x12d   :  { %699 = vset.pattern.permute.xlu1 %v721_v30 }
 0x12e   :  { %291 = vperm.xlu1 %699, %v233_v56  }
 0x130   :  { %v258_v38 = vpop.permute.xlu1 %257  ;;  %v327_v46 = vpop.permute.xlu0 %326 }
 0x131   :  { %v281_v39 = vsub.f32 %v978_v3, %v258_v38  ;;  %v343_v3 = vmul.f32 %v327_v46, %v746_v0  ;;  %v344_v45 = vmul.f32 %v327_v46, %v751_v1 }
 0x133   :  { %347 = vperm.xlu2 %698, %v281_v39   ;;  %v418_v39 = vld [vmem:[%s1130_s2 + $0x8] sm:$0xff] }
 0x138   :  { %v307_v49 = vpop.permute.xlu0 %306 }
 0x139   :  { %v335_v51 = vmul.f32 %v307_v49, %v788_v14  ;;  %v336_v13 = vmul.f32 %v307_v49, %v793_v15  ;;  %v421_v49 = vld [vmem:[%s1130_s2 + $0x20] sm:$0xff] }
 0x140   :  { %v302_v30 = vpop.permute.xlu0 %301 }
 0x141   :  { %v333_v15 = vmul.f32 %v302_v30, %v818_v23  ;;  %v334_v27 = vmul.f32 %v302_v30, %v823_v24 }
 0x148   :  { %v297_v55 = vpop.permute.xlu0 %296 }
 0x149   :  { %v331_v1 = vmul.f32 %v297_v55, %v838_v32  ;;  %v332_v8 = vmul.f32 %v297_v55, %v843_v33  ;;  %v339_v32 = vmul.f32 %v317_v16, %v776_v11  ;;  %v340_v33 = vmul.f32 %v317_v16, %v781_v12  ;;  %v417_v11 = vld [vmem:[%s1130_s2] sm:$0xff] }
 0x165   :  { %v363_v42 = vpop.permute.xlu2 %362 }
 0x166   :  { %v391_v52 = vadd.f32 %v363_v42, %v335_v51  ;;  %v392_v20 = vadd.f32 %v363_v42, %v336_v13  ;;  %v422_v51 = vld [vmem:[%s1130_s2 + $0x28] sm:$0xff]  ;;  %v423_v13 = vld [vmem:[%s1130_s2 + $0x30] sm:$0xff]  ;;  %v424_v42 = vld [vmem:[%s1130_s2 + $0x38] sm:$0xff] }
 0x168   :  { %v407_v53 = vmax.f32 %v391_v52, 0.0  ;;  %v408_v57 = vmax.f32 %v392_v20, 0.0 }
 0x16a   :  { %462 = vmatpush.msra.mxu0 %v407_v53  ;;  %503 = vmatpush.msra.mxu1 %v408_v57 }
 0x17f   :  { %v383_v58 = vpop.permute.xlu1 %382 }
 0x180   :  { %v399_v5 = vadd.f32 %v383_v58, %v343_v3  ;;  %v400_v47 = vadd.f32 %v383_v58, %v344_v45 }
 0x182   :  { %v415_v61 = vmax.f32 %v399_v5, 0.0  ;;  %v416_v14 = vmax.f32 %v400_v47, 0.0 }
 0x184   :  { %560 = vmatpush.msra.mxu2 %v415_v61  ;;  %601 = vmatpush.msra.mxu3 %v416_v14 }
 0x185   :  { %v358_v4 = vpop.permute.xlu2 %357 }
 0x186   :  { %v389_v0 = vadd.f32 %v358_v4, %v333_v15  ;;  %v390_v7 = vadd.f32 %v358_v4, %v334_v27 }
 0x187   :  { %v378_v54 = vpop.permute.xlu1 %377 }
 0x188   :  { %v353_v9 = vpop.permute.xlu0 %352  ;;  %v397_v17 = vadd.f32 %v378_v54, %v341_v59  ;;  %v398_v56 = vadd.f32 %v378_v54, %v342_v31  ;;  %v405_v23 = vmax.f32 %v389_v0, 0.0  ;;  %v406_v22 = vmax.f32 %v390_v7, 0.0 }
 0x189   :  { %v387_v24 = vadd.f32 %v353_v9, %v331_v1  ;;  %v388_v50 = vadd.f32 %v353_v9, %v332_v8 }
 0x18a   :  { %463 = vmatpush.msra.mxu0 %v405_v23  ;;  %504 = vmatpush.msra.mxu1 %v406_v22  ;;  %v413_v62 = vmax.f32 %v397_v17, 0.0  ;;  %v414_v2 = vmax.f32 %v398_v56, 0.0 }
 0x18b   :  { %v403_v44 = vmax.f32 %v387_v24, 0.0  ;;  %v404_v6 = vmax.f32 %v388_v50, 0.0 }
 0x18c   :  { %561 = vmatpush.msra.mxu2 %v413_v62  ;;  %602 = vmatpush.msra.mxu3 %v414_v2 }
 0x18d   :  { %464 = vmatpush.msra.mxu0 %v403_v44  ;;  %505 = vmatpush.msra.mxu1 %v404_v6  ;;  %v348_v38 = vpop.permute.xlu2 %347 }
 0x18f   :  { %v373_v29 = vpop.permute.xlu1 %372 }
 0x190   :  { %v395_v25 = vadd.f32 %v373_v29, %v339_v32  ;;  %v396_v60 = vadd.f32 %v373_v29, %v340_v33 }
 0x192   :  { %v411_v37 = vmax.f32 %v395_v25, 0.0  ;;  %v412_v26 = vmax.f32 %v396_v60, 0.0 }
 0x194   :  { %562 = vmatpush.msra.mxu2 %v411_v37  ;;  %603 = vmatpush.msra.mxu3 %v412_v26 }
 0x197   :  { %v368_v34 = vpop.permute.xlu1 %367 }
 0x198   :  { %v393_v10 = vadd.f32 %v368_v34, %v337_v21  ;;  %v394_v35 = vadd.f32 %v368_v34, %v338_v28 }
 0x19a   :  { %v409_v36 = vmax.f32 %v393_v10, 0.0  ;;  %v410_v48 = vmax.f32 %v394_v35, 0.0 }
 0x19c   :  { %563 = vmatpush.msra.mxu2 %v409_v36  ;;  %604 = vmatpush.msra.mxu3 %v410_v48 }
 0x19d   :  { %667 = vmatmul.msk.f32.vlgmr.msra.gmra.mxu2 %vm425_vm9, %v417_v11  ;;  %675 = vmatmul.msk.f32.vlgmr.msra.gmra.mxu3 %vm425_vm9, %v417_v11 }
 0x1a0   :  { %v292_v12 = vpop.permute.xlu1 %291 }
 0x1a1   :  { %v329_v18 = vmul.f32 %v292_v12, %v858_v40  ;;  %v330_v19 = vmul.f32 %v292_v12, %v863_v41  ;;  %v419_v40 = vld [vmem:[%s1130_s2 + $0x10] sm:$0xff]  ;;  %v420_v41 = vld [vmem:[%s1130_s2 + $0x18] sm:$0xff] }
 0x1a3   :  { %v385_v43 = vadd.f32 %v348_v38, %v329_v18  ;;  %v386_v16 = vadd.f32 %v348_v38, %v330_v19 }
 0x1a5   :  { %v401_v46 = vmax.f32 %v385_v43, 0.0  ;;  %v402_v63 = vmax.f32 %v386_v16, 0.0  ;;  %668 = vmatmul.msk.f32.gmra.mxu2 %vm425_vm9, %v418_v39  ;;  %676 = vmatmul.msk.f32.gmra.mxu3 %vm425_vm9, %v418_v39 }
 0x1a7   :  { %465 = vmatpush.msra.mxu0 %v401_v46  ;;  %506 = vmatpush.msra.mxu1 %v402_v63 }
 0x1a8   :  { %651 = vmatmul.msk.f32.vlgmr.msra.gmra.mxu0 %vm425_vm9, %v417_v11  ;;  %659 = vmatmul.msk.f32.vlgmr.msra.gmra.mxu1 %vm425_vm9, %v417_v11 }
 0x1ad   :  { %669 = vmatmul.msk.f32.gmra.mxu2 %vm425_vm9, %v419_v40  ;;  %677 = vmatmul.msk.f32.gmra.mxu3 %vm425_vm9, %v419_v40 }
 0x1b0   :  { %652 = vmatmul.msk.f32.gmra.mxu0 %vm425_vm9, %v418_v39  ;;  %660 = vmatmul.msk.f32.gmra.mxu1 %vm425_vm9, %v418_v39 }
 0x1b5   :  { %670 = vmatmul.msk.f32.gmra.mxu2 %vm425_vm9, %v420_v41  ;;  %678 = vmatmul.msk.f32.gmra.mxu3 %vm425_vm9, %v420_v41 }
 0x1b8   :  { %653 = vmatmul.msk.f32.gmra.mxu0 %vm425_vm9, %v419_v40  ;;  %661 = vmatmul.msk.f32.gmra.mxu1 %vm425_vm9, %v419_v40 }
 0x1bd   :  { %671 = vmatmul.msk.f32.gmra.mxu2 %vm425_vm9, %v421_v49  ;;  %679 = vmatmul.msk.f32.gmra.mxu3 %vm425_vm9, %v421_v49 }
 0x1c0   :  { %654 = vmatmul.msk.f32.gmra.mxu0 %vm425_vm9, %v420_v41  ;;  %662 = vmatmul.msk.f32.gmra.mxu1 %vm425_vm9, %v420_v41 }
 0x1c5   :  { %672 = vmatmul.msk.f32.gmra.mxu2 %vm425_vm9, %v422_v51  ;;  %680 = vmatmul.msk.f32.gmra.mxu3 %vm425_vm9, %v422_v51 }
 0x1c8   :  { %655 = vmatmul.msk.f32.gmra.mxu0 %vm425_vm9, %v421_v49  ;;  %663 = vmatmul.msk.f32.gmra.mxu1 %vm425_vm9, %v421_v49 }
 0x1cd   :  { %673 = vmatmul.msk.f32.gmra.mxu2 %vm425_vm9, %v423_v13  ;;  %681 = vmatmul.msk.f32.gmra.mxu3 %vm425_vm9, %v423_v13 }
 0x1d0   :  { %656 = vmatmul.msk.f32.gmra.mxu0 %vm425_vm9, %v422_v51  ;;  %664 = vmatmul.msk.f32.gmra.mxu1 %vm425_vm9, %v422_v51 }
 0x1d5   :  { %674 = vmatmul.msk.f32.gmra.mxu2 %vm425_vm9, %v424_v42  ;;  %682 = vmatmul.msk.f32.gmra.mxu3 %vm425_vm9, %v424_v42 }
 0x1d8   :  { %657 = vmatmul.msk.f32.gmra.mxu0 %vm425_vm9, %v423_v13  ;;  %665 = vmatmul.msk.f32.gmra.mxu1 %vm425_vm9, %v423_v13 }
 0x1e0   :  { %658 = vmatmul.msk.f32.gmra.mxu0 %vm425_vm9, %v424_v42  ;;  %666 = vmatmul.msk.f32.gmra.mxu1 %vm425_vm9, %v424_v42 }
 0x220   :  { %v565_v52 = vpop.f32.mrf.mxu2  ;;  %v606_v20 = vpop.f32.mrf.mxu3 }
 0x221   :  { %v630_v53 = vpack.c.bf16 %v606_v20, %v565_v52 }
 0x223   :  { %683 = vst [vmem:[%s1131_s3 + $0x40] sm:$0xff] %v630_v53 }
 0x225   :  { %v467_v57 = vpop.f32.mrf.mxu0  ;;  %v508_v30 = vpop.f32.mrf.mxu1 }
 0x226   :  { %v532_v3 = vpack.c.bf16 %v508_v30, %v467_v57 }
 0x228   :  { %540 = vst [vmem:[%s1131_s3] sm:$0xff] %v532_v3  ;;  %v568_v45 = vpop.f32.mrf.mxu2  ;;  %v609_v58 = vpop.f32.mrf.mxu3 }
 0x229   :  { %v631_v55 = vpack.c.bf16 %v609_v58, %v568_v45 }
 0x22b   :  { %684 = vst [vmem:[%s1131_s3 + $0x48] sm:$0xff] %v631_v55 }
 0x22d   :  { %v470_v5 = vpop.f32.mrf.mxu0  ;;  %v511_v47 = vpop.f32.mrf.mxu1 }
 0x22e   :  { %v533_v61 = vpack.c.bf16 %v511_v47, %v470_v5 }
 0x230   :  { %541 = vst [vmem:[%s1131_s3 + $0x8] sm:$0xff] %v533_v61  ;;  %v571_v14 = vpop.f32.mrf.mxu2  ;;  %v612_v15 = vpop.f32.mrf.mxu3 }
 0x231   :  { %v632_v27 = vpack.c.bf16 %v612_v15, %v571_v14 }
 0x233   :  { %685 = vst [vmem:[%s1131_s3 + $0x50] sm:$0xff] %v632_v27 }
 0x235   :  { %v473_v4 = vpop.f32.mrf.mxu0  ;;  %v514_v59 = vpop.f32.mrf.mxu1 }
 0x236   :  { %v534_v31 = vpack.c.bf16 %v514_v59, %v473_v4 }
 0x238   :  { %542 = vst [vmem:[%s1131_s3 + $0x10] sm:$0xff] %v534_v31  ;;  %v574_v0 = vpop.f32.mrf.mxu2  ;;  %v615_v7 = vpop.f32.mrf.mxu3 }
 0x239   :  { %v633_v1 = vpack.c.bf16 %v615_v7, %v574_v0 }
 0x23b   :  { %686 = vst [vmem:[%s1131_s3 + $0x58] sm:$0xff] %v633_v1 }
 0x23d   :  { %v476_v8 = vpop.f32.mrf.mxu0  ;;  %v517_v54 = vpop.f32.mrf.mxu1 }
 0x23e   :  { %v535_v9 = vpack.c.bf16 %v517_v54, %v476_v8 }
 0x240   :  { %543 = vst [vmem:[%s1131_s3 + $0x18] sm:$0xff] %v535_v9  ;;  %v577_v17 = vpop.f32.mrf.mxu2  ;;  %v618_v56 = vpop.f32.mrf.mxu3 }
 0x241   :  { %v634_v23 = vpack.c.bf16 %v618_v56, %v577_v17 }
 0x243   :  { %687 = vst [vmem:[%s1131_s3 + $0x60] sm:$0xff] %v634_v23 }
 0x245   :  { %v479_v22 = vpop.f32.mrf.mxu0  ;;  %v520_v24 = vpop.f32.mrf.mxu1 }
 0x246   :  { %v536_v50 = vpack.c.bf16 %v520_v24, %v479_v22 }
 0x248   :  { %544 = vst [vmem:[%s1131_s3 + $0x20] sm:$0xff] %v536_v50  ;;  %v580_v62 = vpop.f32.mrf.mxu2  ;;  %v621_v2 = vpop.f32.mrf.mxu3 }
 0x249   :  { %v635_v44 = vpack.c.bf16 %v621_v2, %v580_v62 }
 0x24b   :  { %688 = vst [vmem:[%s1131_s3 + $0x68] sm:$0xff] %v635_v44 }
 0x24d   :  { %v482_v6 = vpop.f32.mrf.mxu0  ;;  %v523_v32 = vpop.f32.mrf.mxu1 }
 0x24e   :  { %v537_v33 = vpack.c.bf16 %v523_v32, %v482_v6 }
 0x250   :  { %545 = vst [vmem:[%s1131_s3 + $0x28] sm:$0xff] %v537_v33  ;;  %v583_v29 = vpop.f32.mrf.mxu2  ;;  %v624_v25 = vpop.f32.mrf.mxu3 }
 0x251   :  { %v636_v60 = vpack.c.bf16 %v624_v25, %v583_v29 }
 0x253   :  { %689 = vst [vmem:[%s1131_s3 + $0x70] sm:$0xff] %v636_v60 }
 0x255   :  { %v485_v37 = vpop.f32.mrf.mxu0  ;;  %v526_v26 = vpop.f32.mrf.mxu1 }
 0x256   :  { %v538_v21 = vpack.c.bf16 %v526_v26, %v485_v37 }
 0x258   :  { %546 = vst [vmem:[%s1131_s3 + $0x30] sm:$0xff] %v538_v21  ;;  %v586_v28 = vpop.f32.mrf.mxu2  ;;  %v627_v34 = vpop.f32.mrf.mxu3 }
 0x259   :  { %v637_v10 = vpack.c.bf16 %v627_v34, %v586_v28 }
 0x25b   :  { %690 = vst [vmem:[%s1131_s3 + $0x78] sm:$0xff] %v637_v10 }
 0x25d   :  { %v488_v35 = vpop.f32.mrf.mxu0  ;;  %v529_v36 = vpop.f32.mrf.mxu1 }
 0x25e   :  { %v539_v48 = vpack.c.bf16 %v529_v36, %v488_v35 }
 0x260   :  { %547 = vst [vmem:[%s1131_s3 + $0x38] sm:$0xff] %v539_v48 }

</bundles_post_ra>
